<compile_context>
chip_gen: v7x
topology: tpu7x:2x2x1
jax: 0.10.0
libtpu: 0.0.40
codegen_flags: <defaults>
</compile_context>

<pallas_src>
import jax
import jax.numpy as jnp
from jax.experimental import pallas as pl
from jax.experimental.pallas import tpu as pltpu

# ----------------------------------------------------------------------------
# Configuration (mirrors the PyTorch module's __init__ bookkeeping)
# ----------------------------------------------------------------------------
LOWER_LIP, UPPER_LIP, TONGUE = "lower-lip", "upper-lip", "tongue"
UPPER_INCISOR, SOFT_PALATE, PHARYNX = "upper-incisor", "soft-palate", "pharynx"

TV_TO_ARTICULATOR_MAP = {
    "LA": [LOWER_LIP, UPPER_LIP],
    "TTCD": [TONGUE, UPPER_INCISOR],
    "TBCD": [TONGUE, UPPER_INCISOR],
    "VEL": [SOFT_PALATE, PHARYNX],
}

ARTICULATORS = sorted([LOWER_LIP, SOFT_PALATE, TONGUE, UPPER_LIP])  # indices_dict keys
TVS = sorted(["LA", "TTCD"])

B, T, D = 2, 8, 16          # batch, sequence length, samples per contour
NART = len(ARTICULATORS)    # 4
F = 2 * D                   # in_features per articulator = 32
H = 32                      # hidden_features
C = 2                       # principal components per articulator (disjoint)
NPC = NART * C              # 8
NTV = len(TVS)              # 2
N = B * T                   # flattened (batch, time) rows = 16
PACKED = NART * F           # 128 -> exactly one MXU lane tile
D_SHIFT = D.bit_length() - 1
assert D == (1 << D_SHIFT), "iota-based replication matrices assume D is a power of 2"

RESCALE = 2.0
BETA1, BETA2, BETA3, BETA4 = 1.0, 1.0, 1.0, 0.0

# Packed activation lane layout inside segment 2 (lanes 128:256 of xd).
SEG_REF, SEG_CM, SEG_PAD = 0, F, F + NTV
XD_LANES = 3 * PACKED           # 384
WB_ROWS = 4 * PACKED + 8        # 520

# --- CriticalLoss articulator-index bookkeeping ------------------------------
INJECT_REFERENCE = UPPER_INCISOR not in ARTICULATORS
ART_INJECTED = sorted(ARTICULATORS + [UPPER_INCISOR]) if INJECT_REFERENCE else list(ARTICULATORS)
ART_INDICES = {a: i for i, a in enumerate(ART_INJECTED)}
REF_INDEX = ART_INDICES[UPPER_INCISOR]


def _injected_to_source(idx):
    """Map an index in the (reference-injected) articulator axis to either None
    (use reference_arrays) or an index into the decoder-output articulator axis."""
    if INJECT_REFERENCE:
        if idx == REF_INDEX:
            return None
        return idx if idx < REF_INDEX else idx - 1
    return idx


TV_SOURCES = []
for _tv in TVS:
    _a1, _a2 = TV_TO_ARTICULATOR_MAP[_tv]
    TV_SOURCES.append((_injected_to_source(ART_INDICES[_a1]),
                       _injected_to_source(ART_INDICES[_a2])))

# Advisory cost estimate (lets XLA schedule the tiny custom call sensibly).
_COST = pl.CostEstimate(
    flops=2 * N * PACKED * PACKED * 4            # four fused (N,128)x(128,128) matmuls
          + 2 * N * D * (D * D) * 4 * NTV,       # eight (N,16)x(16,256) replication matmuls
    transcendentals=N * PACKED + N * NTV,        # tanh + per-TV sqrt
    bytes_accessed=(N * XD_LANES + WB_ROWS * PACKED + 1) * 4,
)


# ----------------------------------------------------------------------------
# Pallas kernel: full forward pass of AutoencoderLoss2 -> scalar loss (SMEM)
# ----------------------------------------------------------------------------
def loss_kernel(xd_ref, wb_ref, out_ref):
    # ---------------- unpack activations (single lane-packed buffer) ---------
    ts = xd_ref[:, 0:PACKED]                           # (N, 128) target contours
    seg2 = xd_ref[:, PACKED:2 * PACKED]                # (N, 128) ref / cm / pad
    pcs_seg = xd_ref[:, 2 * PACKED:3 * PACKED]         # (N, 128) PCs in lanes 0:NPC, zeros after
    ref_arr = seg2[:, SEG_REF:SEG_REF + F]             # (N, 32)  upper-incisor contour
    cm = seg2[:, SEG_CM:SEG_CM + NTV]                  # (N, 2)   critical mask
    pad = seg2[:, SEG_PAD:SEG_PAD + 1]                 # (N, 1)   float padding mask

    # ---------------- unpack fused weights (single buffer) -------------------
    w1e = wb_ref[0:PACKED, :]                          # (128, 128)
    w2e = wb_ref[PACKED:2 * PACKED, :]                 # (128, 128), cols NPC:128 are zero
    w1d = wb_ref[2 * PACKED:3 * PACKED, :]             # (128, 128), rows NPC:128 are zero
    w2d = wb_ref[3 * PACKED:4 * PACKED, :]             # (128, 128)
    bias = wb_ref[4 * PACKED:4 * PACKED + 8, :]        # (8, 128)
    b1e = bias[0:1, :]
    b2e = bias[1:2, :]                                 # lanes NPC:128 are zero
    b1d = bias[2:3, :]
    b2d = bias[3:4, :]

    # ---- encoder (MultiEncoder + tanh): all articulators in one lane-dense pass
    h_e = jnp.maximum(
        jnp.dot(ts, w1e, preferred_element_type=jnp.float32) + b1e, 0.0)    # (N, 128)
    tpcs = jnp.tanh(
        jnp.dot(h_e, w2e, preferred_element_type=jnp.float32) + b2e)        # (N, 128)
    # lanes NPC:128 of tpcs are tanh(0) == 0, matching the zero padding of pcs_seg

    # ---- decoder (MultiDecoder) on rescaled predicted PCs -------------------
    h_d = jnp.maximum(
        jnp.dot(RESCALE * pcs_seg, w1d, preferred_element_type=jnp.float32)
        + b1d, 0.0)                                                          # (N, 128)
    out = jnp.dot(h_d, w2d, preferred_element_type=jnp.float32) + b2d        # (N, 128)

    # ---- masked MSE partials (kept as vectors; reduced to scalars once) -----
    lat_vec = ((pcs_seg - tpcs) ** 2) * pad            # (N, 128), zeros past lane NPC
    rec_vec = ((out - ts) ** 2) * pad                  # (N, 128)

    # ---- CriticalLoss: lane-dense all-pairs min distance per TV -------------
    # Exact 0/1 replication matrices built in-kernel from 2-D iota (no DMA):
    #   REP [i, D*i + j] = 1  (repeat each point D times)
    #   TILE[j, D*i + j] = 1  (tile all points D times)
    lane = jax.lax.broadcasted_iota(jnp.int32, (D, D * D), 1)
    row = jax.lax.broadcasted_iota(jnp.int32, (D, D * D), 0)
    rep = jnp.where((lane >> D_SHIFT) == row, 1.0, 0.0).astype(jnp.float32)   # (D, D*D)
    tile = jnp.where((lane & (D - 1)) == row, 1.0, 0.0).astype(jnp.float32)   # (D, D*D)

    def min_pair_dist(a1, a2):
        # a1, a2: (N, F) contours, x in lanes 0:D, y in lanes D:2D.
        x1b = jnp.dot(a1[:, 0:D], rep, preferred_element_type=jnp.float32)    # (N, D*D)
        y1b = jnp.dot(a1[:, D:F], rep, preferred_element_type=jnp.float32)
        x2b = jnp.dot(a2[:, 0:D], tile, preferred_element_type=jnp.float32)
        y2b = jnp.dot(a2[:, D:F], tile, preferred_element_type=jnp.float32)
        dx = x1b - x2b
        dy = y1b - y2b
        dsq = dx * dx + dy * dy                                               # (N, 256) full-lane VPU
        # min of SQUARED distances, single sqrt (exact: sqrt is monotone)
        return jnp.sqrt(jnp.min(dsq, axis=-1, keepdims=True))                 # (N, 1)

    crit_vec = jnp.zeros_like(pad)                     # (N, 1)
    for tv_i, (s1, s2) in enumerate(TV_SOURCES):
        a1 = ref_arr if s1 is None else out[:, s1 * F:(s1 + 1) * F]
        a2 = ref_arr if s2 is None else out[:, s2 * F:(s2 + 1) * F]
        crit_vec = crit_vec + min_pair_dist(a1, a2) * cm[:, tv_i:tv_i + 1]

    # ---- final scalar reductions + weighted sum (single SMEM scalar store) --
    # Note: no guard on empty padding / empty critical mask (matches PyTorch).
    n_valid = jnp.sum(pad)
    latent_loss = jnp.sum(lat_vec) / (n_valid * NPC)
    recon_loss = jnp.sum(rec_vec) / (n_valid * NART * F)
    critical_loss = jnp.sum(crit_vec) / jnp.sum(cm)
    recognition_loss = jnp.float32(0.0)                # recognizer is None

    out_ref[0, 0] = (BETA1 * latent_loss + BETA2 * recon_loss
                     + BETA3 * critical_loss + BETA4 * recognition_loss)


# ----------------------------------------------------------------------------
# One-time parameter packing (outside the per-step call path)
# ----------------------------------------------------------------------------
def _block_diag(w):
    """(Nart, A, B) -> (Nart*A, Nart*B) block-diagonal matrix."""
    na, a, b = w.shape
    out = jnp.zeros((na * a, na * b), w.dtype)
    for i in range(na):
        out = out.at[i * a:(i + 1) * a, i * b:(i + 1) * b].set(w[i])
    return out


def pack_params(params):
    """Fuse per-articulator MLP weights into one (520, 128) f32 buffer.

    Row layout: [0:128) W1e | [128:256) W2e (cols 0:NPC valid) |
                [256:384) W1d (rows 0:NPC valid) | [384:512) W2d | [512:520) biases.
    """
    w1e = _block_diag(params["w1e"]).astype(jnp.float32)            # (128, 128)
    w2e = _block_diag(params["w2e"]).astype(jnp.float32)            # (128, 8)
    w1d = _block_diag(params["w1d"]).astype(jnp.float32)            # (8, 128)
    w2d = _block_diag(params["w2d"]).astype(jnp.float32)            # (128, 128)

    w2e_pad = jnp.zeros((PACKED, PACKED), jnp.float32).at[:, :NPC].set(w2e)
    w1d_pad = jnp.zeros((PACKED, PACKED), jnp.float32).at[:NPC, :].set(w1d)

    bias = jnp.zeros((8, PACKED), jnp.float32)
    bias = bias.at[0, :].set(params["b1e"].reshape(-1).astype(jnp.float32))
    bias = bias.at[1, :NPC].set(params["b2e"].reshape(-1).astype(jnp.float32))
    bias = bias.at[2, :].set(params["b1d"].reshape(-1).astype(jnp.float32))
    bias = bias.at[3, :].set(params["b2d"].reshape(-1).astype(jnp.float32))

    return jnp.concatenate([w1e, w2e_pad, w1d_pad, w2d, bias], axis=0)   # (520, 128)


# ----------------------------------------------------------------------------
# Per-step wrapper: activation packing (contiguous reshapes + one concat) + call
# ----------------------------------------------------------------------------
@jax.jit
def autoencoder_loss2(output_pcs, target_shapes, reference_arrays, lengths,
                      critical_mask, wb):
    Bs, Ts, Nart, _, Ds = target_shapes.shape
    Nr, Fr = Bs * Ts, 2 * Ds

    ts = target_shapes.reshape(Nr, Nart * Fr).astype(jnp.float32)        # (N, 128)
    ref = reference_arrays.reshape(Nr, Fr).astype(jnp.float32)           # (N, 32)
    pcs = output_pcs.reshape(Nr, Nart * C).astype(jnp.float32)           # (N, 8)
    pad = (jnp.arange(Ts)[None, :] < lengths[:, None]).astype(jnp.float32).reshape(Nr, 1)
    cm = jnp.transpose(critical_mask, (0, 2, 1)).reshape(Nr, NTV).astype(jnp.float32)

    seg2 = jnp.concatenate(
        [ref, cm, pad, jnp.zeros((Nr, PACKED - Fr - NTV - 1), jnp.float32)], axis=-1)
    seg3 = jnp.concatenate(
        [pcs, jnp.zeros((Nr, PACKED - Nart * C), jnp.float32)], axis=-1)
    xd = jnp.concatenate([ts, seg2, seg3], axis=-1)                      # (N, 384)

    out = pl.pallas_call(
        loss_kernel,
        out_shape=jax.ShapeDtypeStruct((1, 1), jnp.float32),
        in_specs=[pl.BlockSpec(memory_space=pltpu.MemorySpace.VMEM),
                  pl.BlockSpec(memory_space=pltpu.MemorySpace.VMEM)],
        out_specs=pl.BlockSpec(memory_space=pltpu.MemorySpace.SMEM),
        cost_estimate=_COST,
    )(xd, wb)
    return out[0, 0]


# ----------------------------------------------------------------------------
# Pure-JAX reference (mirrors the PyTorch forward) for a correctness check
# ----------------------------------------------------------------------------
def reference_loss(output_pcs, target_shapes, reference_arrays, lengths,
                   critical_mask, params):
    hp = jax.lax.Precision.HIGHEST
    x = target_shapes.reshape(N, NART, F)
    pcs = output_pcs.reshape(N, NPC)

    tpcs, outs = [], []
    for a in range(NART):
        h = jax.nn.relu(jnp.dot(x[:, a, :], params["w1e"][a], precision=hp) + params["b1e"][a, 0])
        c = jnp.dot(h, params["w2e"][a], precision=hp) + params["b2e"][a, 0]
        tpcs.append(jnp.tanh(c))
        ca = RESCALE * pcs[:, a * C:(a + 1) * C]
        hd = jax.nn.relu(jnp.dot(ca, params["w1d"][a], precision=hp) + params["b1d"][a, 0])
        outs.append(jnp.dot(hd, params["w2d"][a], precision=hp) + params["b2d"][a, 0])
    tpcs = jnp.concatenate(tpcs, axis=-1)          # (N, NPC)
    out = jnp.stack(outs, axis=1)                  # (N, NART, F)

    pad = (jnp.arange(T)[None, :] < lengths[:, None]).reshape(N)
    latent = ((pcs - tpcs) ** 2)[pad].mean()
    recon = ((out - x) ** 2)[pad].mean()

    ref_flat = reference_arrays.reshape(N, F)
    cm = jnp.transpose(critical_mask, (0, 2, 1)).reshape(N, NTV)
    crit_num, crit_den = 0.0, 0.0
    for tv_i, (s1, s2) in enumerate(TV_SOURCES):
        a1 = ref_flat if s1 is None else out[:, s1, :]
        a2 = ref_flat if s2 is None else out[:, s2, :]
        x1, y1 = a1[:, :D], a1[:, D:]
        x2, y2 = a2[:, :D], a2[:, D:]
        dist = jnp.sqrt((x1[:, :, None] - x2[:, None, :]) ** 2
                        + (y1[:, :, None] - y2[:, None, :]) ** 2)
        mind = dist.min(axis=(1, 2))
        crit_num = crit_num + jnp.sum(mind * cm[:, tv_i])
        crit_den = crit_den + jnp.sum(cm[:, tv_i])
    critical = crit_num / crit_den

    return BETA1 * latent + BETA2 * recon + BETA3 * critical + BETA4 * 0.0


# ----------------------------------------------------------------------------
if __name__ == "__main__":
    key = jax.random.PRNGKey(0)
    ks = jax.random.split(key, 13)

    params = {
        "w1e": 0.1 * jax.random.normal(ks[0], (NART, F, H), jnp.float32),
        "b1e": 0.1 * jax.random.normal(ks[1], (NART, 1, H), jnp.float32),
        "w2e": 0.1 * jax.random.normal(ks[2], (NART, H, C), jnp.float32),
        "b2e": 0.1 * jax.random.normal(ks[3], (NART, 1, C), jnp.float32),
        "w1d": 0.1 * jax.random.normal(ks[4], (NART, C, H), jnp.float32),
        "b1d": 0.1 * jax.random.normal(ks[5], (NART, 1, H), jnp.float32),
        "w2d": 0.1 * jax.random.normal(ks[6], (NART, H, F), jnp.float32),
        "b2d": 0.1 * jax.random.normal(ks[7], (NART, 1, F), jnp.float32),
    }

    output_pcs = jax.random.normal(ks[8], (B, T, NPC), jnp.float32)
    target_shapes = jax.random.normal(ks[9], (B, T, NART, 2, D), jnp.float32)
    reference_arrays = jax.random.normal(ks[10], (B, T, 1, 2, D), jnp.float32)
    lengths = jnp.array([T, T - 3], dtype=jnp.int32)
    critical_mask = (jax.random.uniform(ks[11], (B, NTV, T)) > 0.3).astype(jnp.float32)
    critical_mask = critical_mask.at[:, :, 0].set(1.0)   # guarantee non-empty mask

    # One-time weight fusion (outside the per-step path, per the perf review).
    wb = jax.block_until_ready(pack_params(params))

    loss = autoencoder_loss2(output_pcs, target_shapes, reference_arrays,
                             lengths, critical_mask, wb)
    jax.block_until_ready(loss)

    ref = reference_loss(output_pcs, target_shapes, reference_arrays,
                         lengths, critical_mask, params)
    ref = float(jax.block_until_ready(ref))
    got = float(loss)
    assert abs(got - ref) <= 1e-3 + 5e-3 * abs(ref), (got, ref)

    print("KERNEL_OK")
</pallas_src>

<mosaic_0001>
module attributes {stable_mosaic.version = 11 : i64} {
  func.func @loss_kernel(%arg0: memref<16x384xf32, #tpu.memory_space<vmem>>, %arg1: memref<520x128xf32, #tpu.memory_space<vmem>>, %arg2: memref<1x1xf32, #tpu.memory_space<smem>>) attributes {dimension_semantics = [], scalar_prefetch = 0 : i64, scratch_operands = 0 : i64, tpu.core_type = #tpu.core_type<tc>} {
    %c0 = arith.constant 0 : index
    %c0_0 = arith.constant 0 : index
    %0 = vector.load %arg0[%c0, %c0_0] : memref<16x384xf32, #tpu.memory_space<vmem>>, vector<16x128xf32>
    %c0_1 = arith.constant 0 : index
    %c128 = arith.constant 128 : index
    %1 = vector.load %arg0[%c0_1, %c128] : memref<16x384xf32, #tpu.memory_space<vmem>>, vector<16x128xf32>
    %c0_2 = arith.constant 0 : index
    %c256 = arith.constant 256 : index
    %2 = vector.load %arg0[%c0_2, %c256] : memref<16x384xf32, #tpu.memory_space<vmem>>, vector<16x128xf32>
    %3 = vector.extract_strided_slice %1 {offsets = [0, 0], sizes = [16, 32], strides = [1, 1]} : vector<16x128xf32> to vector<16x32xf32>
    %4 = vector.extract_strided_slice %1 {offsets = [0, 32], sizes = [16, 2], strides = [1, 1]} : vector<16x128xf32> to vector<16x2xf32>
    %5 = vector.extract_strided_slice %1 {offsets = [0, 34], sizes = [16, 1], strides = [1, 1]} : vector<16x128xf32> to vector<16x1xf32>
    %c0_3 = arith.constant 0 : index
    %c0_4 = arith.constant 0 : index
    %6 = vector.load %arg1[%c0_3, %c0_4] : memref<520x128xf32, #tpu.memory_space<vmem>>, vector<128x128xf32>
    %c128_5 = arith.constant 128 : index
    %c0_6 = arith.constant 0 : index
    %7 = vector.load %arg1[%c128_5, %c0_6] : memref<520x128xf32, #tpu.memory_space<vmem>>, vector<128x128xf32>
    %c256_7 = arith.constant 256 : index
    %c0_8 = arith.constant 0 : index
    %8 = vector.load %arg1[%c256_7, %c0_8] : memref<520x128xf32, #tpu.memory_space<vmem>>, vector<128x128xf32>
    %c384 = arith.constant 384 : index
    %c0_9 = arith.constant 0 : index
    %9 = vector.load %arg1[%c384, %c0_9] : memref<520x128xf32, #tpu.memory_space<vmem>>, vector<128x128xf32>
    %c512 = arith.constant 512 : index
    %c0_10 = arith.constant 0 : index
    %10 = vector.load %arg1[%c512, %c0_10] : memref<520x128xf32, #tpu.memory_space<vmem>>, vector<8x128xf32>
    %11 = vector.extract_strided_slice %10 {offsets = [0, 0], sizes = [1, 128], strides = [1, 1]} : vector<8x128xf32> to vector<1x128xf32>
    %12 = vector.extract_strided_slice %10 {offsets = [1, 0], sizes = [1, 128], strides = [1, 1]} : vector<8x128xf32> to vector<1x128xf32>
    %13 = vector.extract_strided_slice %10 {offsets = [2, 0], sizes = [1, 128], strides = [1, 1]} : vector<8x128xf32> to vector<1x128xf32>
    %14 = vector.extract_strided_slice %10 {offsets = [3, 0], sizes = [1, 128], strides = [1, 1]} : vector<8x128xf32> to vector<1x128xf32>
    %cst = arith.constant dense<0.000000e+00> : vector<16x128xf32>
    %15 = tpu.matmul %0, %6, %cst {dimension_numbers = #tpu.dot_dimension_numbers<[1], [0], [0], [1], [0, 0, 1, 1], [], []>} : vector<16x128xf32>, vector<128x128xf32>, vector<16x128xf32> -> vector<16x128xf32>
    %16 = vector.broadcast %11 : vector<1x128xf32> to vector<16x128xf32>
    %17 = arith.addf %15, %16 : vector<16x128xf32>
    %cst_11 = arith.constant 0.000000e+00 : f32
    %18 = vector.broadcast %cst_11 : f32 to vector<16x128xf32>
    %19 = arith.maximumf %17, %18 : vector<16x128xf32>
    %cst_12 = arith.constant dense<0.000000e+00> : vector<16x128xf32>
    %20 = tpu.matmul %19, %7, %cst_12 {dimension_numbers = #tpu.dot_dimension_numbers<[1], [0], [0], [1], [0, 0, 1, 1], [], []>} : vector<16x128xf32>, vector<128x128xf32>, vector<16x128xf32> -> vector<16x128xf32>
    %21 = vector.broadcast %12 : vector<1x128xf32> to vector<16x128xf32>
    %22 = arith.addf %20, %21 : vector<16x128xf32>
    %23 = math.tanh %22 : vector<16x128xf32>
    %cst_13 = arith.constant 2.000000e+00 : f32
    %24 = vector.broadcast %cst_13 : f32 to vector<16x128xf32>
    %25 = arith.mulf %24, %2 : vector<16x128xf32>
    %cst_14 = arith.constant dense<0.000000e+00> : vector<16x128xf32>
    %26 = tpu.matmul %25, %8, %cst_14 {dimension_numbers = #tpu.dot_dimension_numbers<[1], [0], [0], [1], [0, 0, 1, 1], [], []>} : vector<16x128xf32>, vector<128x128xf32>, vector<16x128xf32> -> vector<16x128xf32>
    %27 = vector.broadcast %13 : vector<1x128xf32> to vector<16x128xf32>
    %28 = arith.addf %26, %27 : vector<16x128xf32>
    %cst_15 = arith.constant 0.000000e+00 : f32
    %29 = vector.broadcast %cst_15 : f32 to vector<16x128xf32>
    %30 = arith.maximumf %28, %29 : vector<16x128xf32>
    %cst_16 = arith.constant dense<0.000000e+00> : vector<16x128xf32>
    %31 = tpu.matmul %30, %9, %cst_16 {dimension_numbers = #tpu.dot_dimension_numbers<[1], [0], [0], [1], [0, 0, 1, 1], [], []>} : vector<16x128xf32>, vector<128x128xf32>, vector<16x128xf32> -> vector<16x128xf32>
    %32 = vector.broadcast %14 : vector<1x128xf32> to vector<16x128xf32>
    %33 = arith.addf %31, %32 : vector<16x128xf32>
    %34 = arith.subf %2, %23 : vector<16x128xf32>
    %35 = arith.mulf %34, %34 : vector<16x128xf32>
    %36 = vector.broadcast %5 : vector<16x1xf32> to vector<16x128xf32>
    %37 = arith.mulf %35, %36 : vector<16x128xf32>
    %38 = arith.subf %33, %0 : vector<16x128xf32>
    %39 = arith.mulf %38, %38 : vector<16x128xf32>
    %40 = vector.broadcast %5 : vector<16x1xf32> to vector<16x128xf32>
    %41 = arith.mulf %39, %40 : vector<16x128xf32>
    %42 = tpu.iota {dimensions = array<i32: 1>} : vector<16x256xi32>
    %43 = tpu.iota {dimensions = array<i32: 0>} : vector<16x256xi32>
    %c4_i32 = arith.constant 4 : i32
    %44 = vector.broadcast %c4_i32 : i32 to vector<16x256xi32>
    %45 = arith.shrsi %42, %44 : vector<16x256xi32>
    %46 = arith.cmpi eq, %45, %43 : vector<16x256xi32>
    %cst_17 = arith.constant 1.000000e+00 : f32
    %cst_18 = arith.constant 0.000000e+00 : f32
    %47 = vector.broadcast %cst_17 : f32 to vector<16x256xf32>
    %48 = vector.broadcast %cst_18 : f32 to vector<16x256xf32>
    %49 = arith.select %46, %47, %48 : vector<16x256xi1>, vector<16x256xf32>
    %c15_i32 = arith.constant 15 : i32
    %50 = vector.broadcast %c15_i32 : i32 to vector<16x256xi32>
    %51 = arith.andi %42, %50 : vector<16x256xi32>
    %52 = arith.cmpi eq, %51, %43 : vector<16x256xi32>
    %cst_19 = arith.constant 1.000000e+00 : f32
    %cst_20 = arith.constant 0.000000e+00 : f32
    %53 = vector.broadcast %cst_19 : f32 to vector<16x256xf32>
    %54 = vector.broadcast %cst_20 : f32 to vector<16x256xf32>
    %55 = arith.select %52, %53, %54 : vector<16x256xi1>, vector<16x256xf32>
    %cst_21 = arith.constant 0.000000e+00 : f32
    %56 = vector.broadcast %cst_21 : f32 to vector<16x1xf32>
    %57 = vector.extract_strided_slice %33 {offsets = [0, 0], sizes = [16, 32], strides = [1, 1]} : vector<16x128xf32> to vector<16x32xf32>
    %58 = vector.extract_strided_slice %33 {offsets = [0, 96], sizes = [16, 32], strides = [1, 1]} : vector<16x128xf32> to vector<16x32xf32>
    %59 = vector.extract_strided_slice %57 {offsets = [0, 0], sizes = [16, 16], strides = [1, 1]} : vector<16x32xf32> to vector<16x16xf32>
    %cst_22 = arith.constant dense<0.000000e+00> : vector<16x256xf32>
    %60 = tpu.matmul %59, %49, %cst_22 {dimension_numbers = #tpu.dot_dimension_numbers<[1], [0], [0], [1], [0, 0, 1, 1], [], []>} : vector<16x16xf32>, vector<16x256xf32>, vector<16x256xf32> -> vector<16x256xf32>
    %61 = vector.extract_strided_slice %57 {offsets = [0, 16], sizes = [16, 16], strides = [1, 1]} : vector<16x32xf32> to vector<16x16xf32>
    %cst_23 = arith.constant dense<0.000000e+00> : vector<16x256xf32>
    %62 = tpu.matmul %61, %49, %cst_23 {dimension_numbers = #tpu.dot_dimension_numbers<[1], [0], [0], [1], [0, 0, 1, 1], [], []>} : vector<16x16xf32>, vector<16x256xf32>, vector<16x256xf32> -> vector<16x256xf32>
    %63 = vector.extract_strided_slice %58 {offsets = [0, 0], sizes = [16, 16], strides = [1, 1]} : vector<16x32xf32> to vector<16x16xf32>
    %cst_24 = arith.constant dense<0.000000e+00> : vector<16x256xf32>
    %64 = tpu.matmul %63, %55, %cst_24 {dimension_numbers = #tpu.dot_dimension_numbers<[1], [0], [0], [1], [0, 0, 1, 1], [], []>} : vector<16x16xf32>, vector<16x256xf32>, vector<16x256xf32> -> vector<16x256xf32>
    %65 = vector.extract_strided_slice %58 {offsets = [0, 16], sizes = [16, 16], strides = [1, 1]} : vector<16x32xf32> to vector<16x16xf32>
    %cst_25 = arith.constant dense<0.000000e+00> : vector<16x256xf32>
    %66 = tpu.matmul %65, %55, %cst_25 {dimension_numbers = #tpu.dot_dimension_numbers<[1], [0], [0], [1], [0, 0, 1, 1], [], []>} : vector<16x16xf32>, vector<16x256xf32>, vector<16x256xf32> -> vector<16x256xf32>
    %67 = arith.subf %60, %64 : vector<16x256xf32>
    %68 = arith.subf %62, %66 : vector<16x256xf32>
    %69 = arith.mulf %67, %67 : vector<16x256xf32>
    %70 = arith.mulf %68, %68 : vector<16x256xf32>
    %71 = arith.addf %69, %70 : vector<16x256xf32>
    %cst_26 = arith.constant dense<0x7F800000> : vector<16xf32>
    %72 = vector.multi_reduction <minimumf>, %71, %cst_26 [1] : vector<16x256xf32> to vector<16xf32>
    %73 = vector.shape_cast %72 : vector<16xf32> to vector<16x1xf32>
    %74 = math.sqrt %73 : vector<16x1xf32>
    %75 = vector.extract_strided_slice %4 {offsets = [0, 0], sizes = [16, 1], strides = [1, 1]} : vector<16x2xf32> to vector<16x1xf32>
    %76 = arith.mulf %74, %75 : vector<16x1xf32>
    %77 = arith.addf %56, %76 : vector<16x1xf32>
    %78 = vector.extract_strided_slice %33 {offsets = [0, 64], sizes = [16, 32], strides = [1, 1]} : vector<16x128xf32> to vector<16x32xf32>
    %79 = vector.extract_strided_slice %78 {offsets = [0, 0], sizes = [16, 16], strides = [1, 1]} : vector<16x32xf32> to vector<16x16xf32>
    %cst_27 = arith.constant dense<0.000000e+00> : vector<16x256xf32>
    %80 = tpu.matmul %79, %49, %cst_27 {dimension_numbers = #tpu.dot_dimension_numbers<[1], [0], [0], [1], [0, 0, 1, 1], [], []>} : vector<16x16xf32>, vector<16x256xf32>, vector<16x256xf32> -> vector<16x256xf32>
    %81 = vector.extract_strided_slice %78 {offsets = [0, 16], sizes = [16, 16], strides = [1, 1]} : vector<16x32xf32> to vector<16x16xf32>
    %cst_28 = arith.constant dense<0.000000e+00> : vector<16x256xf32>
    %82 = tpu.matmul %81, %49, %cst_28 {dimension_numbers = #tpu.dot_dimension_numbers<[1], [0], [0], [1], [0, 0, 1, 1], [], []>} : vector<16x16xf32>, vector<16x256xf32>, vector<16x256xf32> -> vector<16x256xf32>
    %83 = vector.extract_strided_slice %3 {offsets = [0, 0], sizes = [16, 16], strides = [1, 1]} : vector<16x32xf32> to vector<16x16xf32>
    %cst_29 = arith.constant dense<0.000000e+00> : vector<16x256xf32>
    %84 = tpu.matmul %83, %55, %cst_29 {dimension_numbers = #tpu.dot_dimension_numbers<[1], [0], [0], [1], [0, 0, 1, 1], [], []>} : vector<16x16xf32>, vector<16x256xf32>, vector<16x256xf32> -> vector<16x256xf32>
    %85 = vector.extract_strided_slice %3 {offsets = [0, 16], sizes = [16, 16], strides = [1, 1]} : vector<16x32xf32> to vector<16x16xf32>
    %cst_30 = arith.constant dense<0.000000e+00> : vector<16x256xf32>
    %86 = tpu.matmul %85, %55, %cst_30 {dimension_numbers = #tpu.dot_dimension_numbers<[1], [0], [0], [1], [0, 0, 1, 1], [], []>} : vector<16x16xf32>, vector<16x256xf32>, vector<16x256xf32> -> vector<16x256xf32>
    %87 = arith.subf %80, %84 : vector<16x256xf32>
    %88 = arith.subf %82, %86 : vector<16x256xf32>
    %89 = arith.mulf %87, %87 : vector<16x256xf32>
    %90 = arith.mulf %88, %88 : vector<16x256xf32>
    %91 = arith.addf %89, %90 : vector<16x256xf32>
    %cst_31 = arith.constant dense<0x7F800000> : vector<16xf32>
    %92 = vector.multi_reduction <minimumf>, %91, %cst_31 [1] : vector<16x256xf32> to vector<16xf32>
    %93 = vector.shape_cast %92 : vector<16xf32> to vector<16x1xf32>
    %94 = math.sqrt %93 : vector<16x1xf32>
    %95 = vector.extract_strided_slice %4 {offsets = [0, 1], sizes = [16, 1], strides = [1, 1]} : vector<16x2xf32> to vector<16x1xf32>
    %96 = arith.mulf %94, %95 : vector<16x1xf32>
    %97 = arith.addf %77, %96 : vector<16x1xf32>
    %98 = vector.shape_cast %5 : vector<16x1xf32> to vector<1x16x1xf32>
    %cst_32 = arith.constant dense<0.000000e+00> : vector<1xf32>
    %99 = vector.multi_reduction <add>, %98, %cst_32 [1, 2] : vector<1x16x1xf32> to vector<1xf32>
    %100 = vector.shape_cast %99 : vector<1xf32> to vector<1x1x1xf32>
    %101 = vector.extract %100[0, 0, 0] : f32 from vector<1x1x1xf32>
    %102 = vector.shape_cast %37 : vector<16x128xf32> to vector<1x16x128xf32>
    %cst_33 = arith.constant dense<0.000000e+00> : vector<1xf32>
    %103 = vector.multi_reduction <add>, %102, %cst_33 [1, 2] : vector<1x16x128xf32> to vector<1xf32>
    %104 = vector.shape_cast %103 : vector<1xf32> to vector<1x1x1xf32>
    %105 = vector.extract %104[0, 0, 0] : f32 from vector<1x1x1xf32>
    %cst_34 = arith.constant 8.000000e+00 : f32
    %106 = arith.mulf %101, %cst_34 : f32
    %107 = arith.divf %105, %106 : f32
    %108 = vector.shape_cast %41 : vector<16x128xf32> to vector<1x16x128xf32>
    %cst_35 = arith.constant dense<0.000000e+00> : vector<1xf32>
    %109 = vector.multi_reduction <add>, %108, %cst_35 [1, 2] : vector<1x16x128xf32> to vector<1xf32>
    %110 = vector.shape_cast %109 : vector<1xf32> to vector<1x1x1xf32>
    %111 = vector.extract %110[0, 0, 0] : f32 from vector<1x1x1xf32>
    %cst_36 = arith.constant 4.000000e+00 : f32
    %112 = arith.mulf %101, %cst_36 : f32
    %cst_37 = arith.constant 3.200000e+01 : f32
    %113 = arith.mulf %112, %cst_37 : f32
    %114 = arith.divf %111, %113 : f32
    %115 = vector.shape_cast %97 : vector<16x1xf32> to vector<1x16x1xf32>
    %cst_38 = arith.constant dense<0.000000e+00> : vector<1xf32>
    %116 = vector.multi_reduction <add>, %115, %cst_38 [1, 2] : vector<1x16x1xf32> to vector<1xf32>
    %117 = vector.shape_cast %116 : vector<1xf32> to vector<1x1x1xf32>
    %118 = vector.extract %117[0, 0, 0] : f32 from vector<1x1x1xf32>
    %119 = vector.shape_cast %4 : vector<16x2xf32> to vector<1x16x2xf32>
    %cst_39 = arith.constant dense<0.000000e+00> : vector<1xf32>
    %120 = vector.multi_reduction <add>, %119, %cst_39 [1, 2] : vector<1x16x2xf32> to vector<1xf32>
    %121 = vector.shape_cast %120 : vector<1xf32> to vector<1x1x1xf32>
    %122 = vector.extract %121[0, 0, 0] : f32 from vector<1x1x1xf32>
    %123 = arith.divf %118, %122 : f32
    %cst_40 = arith.constant 1.000000e+00 : f32
    %124 = arith.mulf %cst_40, %107 : f32
    %cst_41 = arith.constant 1.000000e+00 : f32
    %125 = arith.mulf %cst_41, %114 : f32
    %126 = arith.addf %124, %125 : f32
    %cst_42 = arith.constant 1.000000e+00 : f32
    %127 = arith.mulf %cst_42, %123 : f32
    %128 = arith.addf %126, %127 : f32
    %cst_43 = arith.constant 0.000000e+00 : f32
    %cst_44 = arith.constant 0.000000e+00 : f32
    %129 = arith.mulf %cst_43, %cst_44 : f32
    %130 = arith.addf %128, %129 : f32
    %c0_45 = arith.constant 0 : index
    %c0_46 = arith.constant 0 : index
    %131 = memref.load %arg2[%c0_45, %c0_46] : memref<1x1xf32, #tpu.memory_space<smem>>
    memref.store %130, %arg2[%c0_45, %c0_46] : memref<1x1xf32, #tpu.memory_space<smem>>
    return
  }
}

</mosaic_0001>

<bundles_post_ra>
// kernel: autoencoder_loss2.1
= control target key start
LH: loop header
LB: loop body
LE: loop exit
PB: predicated region body
PF: predicated region fallthrough
CT: control target
= control target key end

     0   :  { %7 = vsyncpa [#allocation3], 0  ;;  %s2110_s0 = inlined_call_operand.vmem [shape: f32[16,384], index: 0, kind: input, shape index: {}]   ;;  %s2111_s1 = inlined_call_operand.hbm [shape: f32[520,128], index: 1, kind: input, shape index: {}]   ;;  %s2112_s2 = inlined_call_operand.hbm [shape: f32[1,1], index: 2, kind: output, shape index: {}]  }
   0x1   :  { %8 = vsyncpa [#allocation4], 0  ;;  %s1859_s9 = smov [#allocation2]   ;;  %s1823_s13 = scalar_lea.hbm %s2111_s1, 8320 }
   0x2   :  { %s16_s10 = sshll.u32 %s1859_s9, 4  ;;  %p1824_p0 = scmp.ne.s32.totalorder %s2111_s1, %s1823_s13  ;;  %s17_s10 = int_to_ptr.vmem [resolvable:$true] %s16_s10 }
   0x3   :  { %p1827_p1 = scmp.lt.u32.totalorder %s1823_s13, %s2111_s1 }
   0x5   :  { %p1829_p2 = pnand %p1827_p1, %p1824_p0 }
   0x7   :  { %1832 = shalt.err (!%p1829_p2)
}
   0x8   :  { %s1833_s18 = scalar_lea.vmem %s17_s10, 8320  ;;  %p1838_p4 = scmp.lt.s32.totalorder %s17_s10, %s17_s10 }
   0x9   :  { %p1834_p3 = scmp.ne.s32.totalorder %s17_s10, %s1833_s18  ;;  %p1839_p5 = scmp.lt.s32.totalorder %s1833_s18, %s1833_s18 }
   0xb   :  { %p1840_p6 = por %p1839_p5, %p1838_p4 }
   0xd   :  { %p1841_p7 = pnand %p1840_p6, %p1834_p3 }
   0xf   :  { %1844 = shalt.err (!%p1841_p7)
}
  0x10   :  { %s1860_s19 = smov 128   ;;  %s1861_s20 = smov 8  }
  0x11   :  { %22 = dma.hbm_to_vmem [thread:$0]  %s2111_s1, 8320, %s17_s10, [#allocation3], %s1860_s19, %s1860_s19, %s1861_s20  }
  0x12   :  { %1855 = dma.done.wait [#allocation3], 8320  }
  0x13   :  { %1856 = vsyncadd [#allocation3], 4294958976  ;;  %v32_v0 = vld [vmem:[#allocation2] sm:$0xff]  ;;  %v33_v1 = vld [vmem:[#allocation2 + $0x8] sm:$0xff]  ;;  %vm469_vm12 = vcmask 130048   ;;  %s1864_s30 = smov 32  }
  0x14   :  { %v34_v2 = vld [vmem:[#allocation2 + $0x10] sm:$0xff]  ;;  %v1612_v3 = vpack.c.bf16 %v33_v1, %v32_v0  ;;  %v35_v4 = vld [vmem:[#allocation2 + $0x18] sm:$0xff]  ;;  %v36_v6 = vld [vmem:[#allocation2 + $0x20] sm:$0xff]  ;;  %s1865_s3 = smov 112   ;;  %s1866_s4 = smov 16  }
  0x15   :  { %v1616_v5 = vpack.c.bf16 %v35_v4, %v34_v2  ;;  %v37_v7 = vld [vmem:[#allocation2 + $0x28] sm:$0xff]  ;;  %v1904_v9 = vld [vmem:[%s2110_s0] sm:$0xff]  ;;  %v38_v10 = vld [vmem:[#allocation2 + $0x30] sm:$0xff]  ;;  %s1867_s5 = smov 48   ;;  %s1868_s6 = smov 64  }
  0x16   :  { %1613 = vmatprep.subr.bf16.mxu0 %v1612_v3  ;;  %v1620_v8 = vpack.c.bf16 %v37_v7, %v36_v6  ;;  %v39_v11 = vld [vmem:[#allocation2 + $0x38] sm:$0xff]  ;;  %1504 = vmatprep.mubr.f32.mxu0 %v1904_v9  ;;  %v40_v13 = vld [vmem:[#allocation2 + $0x40] sm:$0xff]  ;;  %v41_v14 = vld [vmem:[#allocation2 + $0x48] sm:$0xff]  ;;  %s1871_s11 = smov 96   ;;  %s1872_s12 = smov 127  }
  0x17   :  { %1615 = vmatpush3.bf16.msra.mxu0 %v1612_v3  ;;  %v1624_v12 = vpack.c.bf16 %v39_v11, %v38_v10  ;;  %v48_v15 = vld [vmem:[#allocation2 + $0x80] sm:$0xff]  ;;  %v49_v16 = vld [vmem:[#allocation2 + $0x88] sm:$0xff]  ;;  %v50_v17 = vld [vmem:[#allocation2 + $0x90] sm:$0xff]  ;;  %v1628_v18 = vpack.c.bf16 %v41_v14, %v40_v13 }
  0x18   :  { %1617 = vmatprep.subr.bf16.mxu0 %v1616_v5  ;;  %v42_v19 = vld [vmem:[#allocation2 + $0x50] sm:$0xff]  ;;  %v1644_v20 = vpack.c.bf16 %v49_v16, %v48_v15  ;;  %v51_v21 = vld [vmem:[#allocation2 + $0x98] sm:$0xff]  ;;  %v52_v24 = vld [vmem:[#allocation2 + $0xa0] sm:$0xff] }
  0x19   :  { %v43_v22 = vld [vmem:[#allocation2 + $0x58] sm:$0xff]  ;;  %v1648_v23 = vpack.c.bf16 %v51_v21, %v50_v17  ;;  %v53_v25 = vld [vmem:[#allocation2 + $0xa8] sm:$0xff]  ;;  %v44_v27 = vld [vmem:[#allocation2 + $0x60] sm:$0xff] }
  0x1a   :  { %1645 = vmatprep.subr.bf16.mxu1 %v1644_v20  ;;  %v1632_v26 = vpack.c.bf16 %v43_v22, %v42_v19  ;;  %v1652_v28 = vpack.c.bf16 %v53_v25, %v52_v24  ;;  %v45_v29 = vld [vmem:[#allocation2 + $0x68] sm:$0xff]  ;;  %v54_v30 = vld [vmem:[#allocation2 + $0xb0] sm:$0xff]  ;;  %v55_v31 = vld [vmem:[#allocation2 + $0xb8] sm:$0xff] }
  0x1b   :  { %1619 = vmatpush3.bf16.msra.mxu0 %v1616_v5  ;;  %1647 = vmatpush3.bf16.msra.mxu1 %v1644_v20  ;;  %v1636_v32 = vpack.c.bf16 %v45_v29, %v44_v27  ;;  %v46_v33 = vld [vmem:[#allocation2 + $0x70] sm:$0xff]  ;;  %v1656_v34 = vpack.c.bf16 %v55_v31, %v54_v30  ;;  %v47_v35 = vld [vmem:[#allocation2 + $0x78] sm:$0xff]  ;;  %v56_v36 = vld [vmem:[#allocation2 + $0xc0] sm:$0xff] }
  0x1c   :  { %1621 = vmatprep.subr.bf16.mxu0 %v1620_v8  ;;  %1649 = vmatprep.subr.bf16.mxu1 %v1648_v23  ;;  %v57_v37 = vld [vmem:[#allocation2 + $0xc8] sm:$0xff]  ;;  %v1640_v38 = vpack.c.bf16 %v47_v35, %v46_v33  ;;  %v64_v39 = vld [vmem:[#allocation2 + $0x100] sm:$0xff]  ;;  %v58_v42 = vld [vmem:[#allocation2 + $0xd0] sm:$0xff] }
  0x1d   :  { %v1660_v40 = vpack.c.bf16 %v57_v37, %v56_v36  ;;  %v65_v41 = vld [vmem:[#allocation2 + $0x108] sm:$0xff]  ;;  %v59_v43 = vld [vmem:[#allocation2 + $0xd8] sm:$0xff]  ;;  %v1910_v45 = vld [vmem:[%s2110_s0 + $0x10] sm:$0xff] }
  0x1e   :  { %v1676_v44 = vpack.c.bf16 %v65_v41, %v64_v39  ;;  %v1664_v46 = vpack.c.bf16 %v59_v43, %v58_v42  ;;  %v66_v47 = vld [vmem:[#allocation2 + $0x110] sm:$0xff]  ;;  %v67_v48 = vld [vmem:[#allocation2 + $0x118] sm:$0xff]  ;;  %v60_v49 = vld [vmem:[#allocation2 + $0xe0] sm:$0xff]  ;;  %v259_v52 = vmul.f32 2.0, %v1910_v45 }
  0x1f   :  { %1623 = vmatpush3.bf16.msra.mxu0 %v1620_v8  ;;  %1651 = vmatpush3.bf16.msra.mxu1 %v1648_v23  ;;  %v61_v50 = vld [vmem:[#allocation2 + $0xe8] sm:$0xff]  ;;  %v1915_v51 = vld [vmem:[%s2110_s0 + $0x18] sm:$0xff]  ;;  %v1680_v53 = vpack.c.bf16 %v67_v48, %v66_v47  ;;  %v68_v54 = vld [vmem:[#allocation2 + $0x120] sm:$0xff] }
  0x20   :  { %1625 = vmatprep.subr.bf16.mxu0 %v1624_v12  ;;  %1653 = vmatprep.subr.bf16.mxu1 %v1652_v28  ;;  %v69_v55 = vld [vmem:[#allocation2 + $0x128] sm:$0xff]  ;;  %v1668_v56 = vpack.c.bf16 %v61_v50, %v60_v49  ;;  %v70_v58 = vld [vmem:[#allocation2 + $0x130] sm:$0xff]  ;;  %v71_v59 = vld [vmem:[#allocation2 + $0x138] sm:$0xff] }
  0x21   :  { %v1684_v57 = vpack.c.bf16 %v69_v55, %v68_v54  ;;  %v1688_v60 = vpack.c.bf16 %v71_v59, %v70_v58  ;;  %v72_v61 = vld [vmem:[#allocation2 + $0x140] sm:$0xff]  ;;  %v73_v62 = vld [vmem:[#allocation2 + $0x148] sm:$0xff]  ;;  %v74_v0 = vld [vmem:[#allocation2 + $0x150] sm:$0xff] }
  0x22   :  { %v1692_v63 = vpack.c.bf16 %v73_v62, %v72_v61  ;;  %v75_v1 = vld [vmem:[#allocation2 + $0x158] sm:$0xff]  ;;  %v76_v3 = vld [vmem:[#allocation2 + $0x160] sm:$0xff]  ;;  %v77_v4 = vld [vmem:[#allocation2 + $0x168] sm:$0xff] }
  0x23   :  { %1627 = vmatpush3.bf16.msra.mxu0 %v1624_v12  ;;  %1655 = vmatpush3.bf16.msra.mxu1 %v1652_v28  ;;  %v1696_v2 = vpack.c.bf16 %v75_v1, %v74_v0  ;;  %v1700_v5 = vpack.c.bf16 %v77_v4, %v76_v3  ;;  %v78_v6 = vld [vmem:[#allocation2 + $0x170] sm:$0xff]  ;;  %v79_v7 = vld [vmem:[#allocation2 + $0x178] sm:$0xff]  ;;  %v1922_v10 = vld [vmem:[%s2110_s0 + $0x28] sm:$0xff]  ;;  %v1863_v4 = vmov 0.0  }
  0x24   :  { %1629 = vmatprep.subr.bf16.mxu0 %v1628_v18  ;;  %1657 = vmatprep.subr.bf16.mxu1 %v1656_v34  ;;  %v1704_v8 = vpack.c.bf16 %v79_v7, %v78_v6  ;;  %v260_v11 = vmul.f32 2.0, %v1922_v10  ;;  %v62_v12 = vld [vmem:[#allocation2 + $0xf0] sm:$0xff]  ;;  %v63_v13 = vld [vmem:[#allocation2 + $0xf8] sm:$0xff]  ;;  %v80_v15 = vld [vmem:[#allocation2 + $0x180] sm:$0xff] }
  0x25   :  { %v1672_v14 = vpack.c.bf16 %v63_v13, %v62_v12  ;;  %v81_v16 = vld [vmem:[#allocation2 + $0x188] sm:$0xff]  ;;  %v1928_v21 = vld [vmem:[#allocation2 + $0x200] sm:$0xff]  ;;  %v82_v27 = vld [vmem:[#allocation2 + $0x190] sm:$0xff] }
  0x26   :  { %v1708_v17 = vpack.c.bf16 %v81_v16, %v80_v15  ;;  %v83_v28 = vld [vmem:[#allocation2 + $0x198] sm:$0xff]  ;;  %v85_v33 = vld [vmem:[#allocation2 + $0x1a8] sm:$0xff]  ;;  %v86_v35 = vld [vmem:[#allocation2 + $0x1b0] sm:$0xff] }
  0x27   :  { %1631 = vmatpush3.bf16.msra.mxu0 %v1628_v18  ;;  %1659 = vmatpush3.bf16.msra.mxu1 %v1656_v34  ;;  %v97_v18 = vlaneseq  ;;  %v1712_v31 = vpack.c.bf16 %v83_v28, %v82_v27  ;;  %v87_v36 = vld [vmem:[#allocation2 + $0x1b8] sm:$0xff]  ;;  %v89_v39 = vld [vmem:[#allocation2 + $0x1c8] sm:$0xff]  ;;  %v90_v41 = vld [vmem:[#allocation2 + $0x1d0] sm:$0xff] }
  0x28   :  { %1633 = vmatprep.subr.bf16.mxu0 %v1632_v26  ;;  %1661 = vmatprep.subr.bf16.mxu1 %v1660_v40  ;;  %v1720_v37 = vpack.c.bf16 %v87_v36, %v86_v35  ;;  %v91_v42 = vld [vmem:[#allocation2 + $0x1d8] sm:$0xff]  ;;  %v94_v49 = vld [vmem:[#allocation2 + $0x1f0] sm:$0xff] }
  0x29   :  { %v1925_v19 = vshrl.u32 %v97_v18, 7  ;;  %v1728_v43 = vpack.c.bf16 %v91_v42, %v90_v41  ;;  %v95_v50 = vld [vmem:[#allocation2 + $0x1f8] sm:$0xff] }
  0x2b   :  { %1635 = vmatpush3.bf16.msra.mxu0 %v1632_v26  ;;  %1663 = vmatpush3.bf16.msra.mxu1 %v1660_v40  ;;  %v99_v20 = vsub.s32 0, %v1925_v19  ;;  %v263_v48 = vsub.s32 2, %v1925_v19  ;;  %v448_v62 = vadd.s32 8, %v1925_v19  ;;  %v344_v13 = vsub.s32 3, %v1925_v19 }
  0x2c   :  { %1637 = vmatprep.subr.bf16.mxu0 %v1636_v32  ;;  %1665 = vmatprep.subr.bf16.mxu1 %v1664_v46 }
  0x2d   :  { %v100_v22 = vrot.slane %v1928_v21, %v99_v20  ;;  %v2009_v20 = vld [vmem:[%s2110_s0 + $0x8] sm:$0xff] }
  0x2f   :  { %1639 = vmatpush3.bf16.msra.mxu0 %v1636_v32  ;;  %1667 = vmatpush3.bf16.msra.mxu1 %v1664_v46  ;;  %v84_v32 = vld [vmem:[#allocation2 + $0x1a0] sm:$0xff]  ;;  %v93_v46 = vld [vmem:[#allocation2 + $0x1e8] sm:$0xff] }
  0x30   :  { %1641 = vmatprep.subr.bf16.mxu0 %v1640_v38  ;;  %1669 = vmatprep.subr.bf16.mxu1 %v1668_v56  ;;  %v1716_v34 = vpack.c.bf16 %v85_v33, %v84_v32 }
  0x33   :  { %1643 = vmatpush3.bf16.msra.mxu0 %v1640_v38  ;;  %1671 = vmatpush3.bf16.msra.mxu1 %v1668_v56  ;;  %v88_v38 = vld [vmem:[#allocation2 + $0x1c0] sm:$0xff] }
  0x34   :  { %1677 = vmatprep.subr.bf16.mxu0 %v1676_v44  ;;  %1673 = vmatprep.subr.bf16.mxu1 %v1672_v14  ;;  %v1724_v40 = vpack.c.bf16 %v89_v39, %v88_v38  ;;  %v1869_v39 = vmov 34  }
  0x35   :  { %1803 = vset.pattern.permute.xlu0 %v1869_v39  ;;  %1804 = vset.pattern.permute.xlu1 %v1869_v39 }
  0x36   :  { %1505 = vmatmul.mubr.f32.vlgmr.msra.gmra.mrb[0].mxu0 %v1915_v51 }
  0x37   :  { %1679 = vmatpush3.bf16.msra.mxu0 %v1676_v44  ;;  %1574 = vmatprep.mubr.f32.mxu0 %v259_v52  ;;  %v92_v44 = vld [vmem:[#allocation2 + $0x1e0] sm:$0xff]  ;;  %v264_v52 = vrot.slane %v1928_v21, %v263_v48 }
  0x38   :  { %1681 = vmatprep.subr.bf16.mxu0 %v1680_v53  ;;  %1675 = vmatpush3.bf16.msra.mxu1 %v1672_v14  ;;  %v1732_v47 = vpack.c.bf16 %v93_v46, %v92_v44  ;;  %v345_v14 = vrot.slane %v1928_v21, %v344_v13 }
  0x39   :  { %1709 = vmatprep.subr.bf16.mxu1 %v1708_v17 }
  0x3b   :  { %1683 = vmatpush3.bf16.msra.mxu0 %v1680_v53  ;;  %v1736_v53 = vpack.c.bf16 %v95_v50, %v94_v49 }
  0x3c   :  { %1685 = vmatprep.subr.bf16.mxu0 %v1684_v57 }
  0x3f   :  { %1687 = vmatpush3.bf16.msra.mxu0 %v1684_v57 }
  0x40   :  { %1689 = vmatprep.subr.bf16.mxu0 %v1688_v60 }
  0x43   :  { %1691 = vmatpush3.bf16.msra.mxu0 %v1688_v60  ;;  %v444_v60 = vand.u32 127, %v97_v18 }
  0x44   :  { %1693 = vmatprep.subr.bf16.mxu0 %v1692_v63 }
  0x45   :  { %v445_v61 = vadd.s32 128, %v444_v60  ;;  %v449_v0 = vshra.s32 %v444_v60, 4  ;;  %v459_v6 = vand.u32 15, %v444_v60 }
  0x47   :  { %1695 = vmatpush3.bf16.msra.mxu0 %v1692_v63  ;;  %v450_v63 = vshra.s32 %v445_v61, 4  ;;  %vm451_vm3 = vcmp.eq.s32.totalorder %v449_v0, %v1925_v19  ;;  %vm453_vm4 = vcmp.eq.s32.totalorder %v449_v0, %v448_v62  ;;  %vm461_vm8 = vcmp.eq.s32.totalorder %v459_v6, %v1925_v19 }
  0x48   :  { %1697 = vmatprep.subr.bf16.mxu0 %v1696_v2  ;;  %vm1943_vm5 = vmpackc.low %vm453_vm4, %vm451_vm3  ;;  %vm463_vm9 = vcmp.eq.s32.totalorder %v459_v6, %v448_v62 }
  0x49   :  { %vm452_vm0 = vcmp.eq.s32.totalorder %v450_v63, %v1925_v19  ;;  %vm454_vm1 = vcmp.eq.s32.totalorder %v450_v63, %v448_v62  ;;  %vm1967_vm11 = vmpackc.low %vm463_vm9, %vm461_vm8 }
  0x4a   :  { %vm1935_vm2 = vmpackc.low %vm454_vm1, %vm452_vm0  ;;  %vm1246_vm1 = vcmask 7168  }
  0x4b   :  { %1699 = vmatpush3.bf16.msra.mxu0 %v1696_v2  ;;  %v1862_v2 = vmov 1.0|1.0  }
  0x4c   :  { %1701 = vmatprep.subr.bf16.mxu0 %v1700_v5 }
  0x4f   :  { %1703 = vmatpush3.bf16.msra.mxu0 %v1700_v5  ;;  %v460_v5 = vand.u32 15, %v445_v61 }
  0x50   :  { %1705 = vmatprep.subr.bf16.mxu0 %v1704_v8 }
  0x51   :  { %vm462_vm6 = vcmp.eq.s32.totalorder %v460_v5, %v1925_v19  ;;  %vm464_vm7 = vcmp.eq.s32.totalorder %v460_v5, %v448_v62 }
  0x52   :  { %vm1960_vm10 = vmpackc.low %vm464_vm7, %vm462_vm6  ;;  %vm1316_vm6 = vcmask 15360  }
  0x53   :  { %1707 = vmatpush3.bf16.msra.mxu0 %v1704_v8 }
  0x54   :  { %1741 = vmatprep.subr.msk.bf16.mxu0 %vm1935_vm2, %v1862_v2 }
  0x56   :  { %1575 = vmatmul.mubr.f32.vlgmr.msra.gmra.mrb[2].mxu0 %v260_v11 }
  0x57   :  { %1743 = vmatpush1.bf16.msk.msra.mxu0 %vm1943_vm5, %v1862_v2  ;;  %540 = vmatprep.mubr.f32.mxu0 %v1863_v4 }
  0x58   :  { %1749 = vmatprep.subr.msk.bf16.mxu0 %vm1960_vm10, %v1862_v2 }
 0x109   :  { %v1506_v23 = vpop.f32.mrb[0].mxu0 }
 0x10a   :  { %v173_v24 = vadd.f32 %v1506_v23, %v100_v22  ;;  %v167_v25 = vpop.f32.mrb[1].mxu0 }
 0x10b   :  { %v168_v26 = vadd.f32 %v167_v25, %v100_v22  ;;  %v2014_v22 = vld [vmem:[%s2110_s0 + $0x20] sm:$0xff]  ;;  %s1870_s0 = smov 94  }
 0x10c   :  { %v177_v29 = vmax.f32 %v173_v24, 0.0 }
 0x10d   :  { %v176_v30 = vmax.f32 %v168_v26, 0.0 }
 0x10f   :  { %1539 = vmatprep.mubr.f32.mxu1 %v176_v30 }
 0x110   :  { %1540 = vmatmul.mubr.f32.vlgmr.msra.gmra.mrb[0].mxu1 %v177_v29 }
 0x111   :  { %1711 = vmatpush3.bf16.msra.mxu1 %v1708_v17 }
 0x112   :  { %1713 = vmatprep.subr.bf16.mxu1 %v1712_v31 }
 0x115   :  { %1715 = vmatpush3.bf16.msra.mxu1 %v1712_v31 }
 0x116   :  { %1717 = vmatprep.subr.bf16.mxu1 %v1716_v34 }
 0x119   :  { %1719 = vmatpush3.bf16.msra.mxu1 %v1716_v34 }
 0x11a   :  { %1721 = vmatprep.subr.bf16.mxu1 %v1720_v37 }
 0x11d   :  { %1723 = vmatpush3.bf16.msra.mxu1 %v1720_v37 }
 0x11e   :  { %1725 = vmatprep.subr.bf16.mxu1 %v1724_v40 }
 0x121   :  { %1727 = vmatpush3.bf16.msra.mxu1 %v1724_v40 }
 0x122   :  { %1729 = vmatprep.subr.bf16.mxu1 %v1728_v43 }
 0x125   :  { %1731 = vmatpush3.bf16.msra.mxu1 %v1728_v43 }
 0x126   :  { %1733 = vmatprep.subr.bf16.mxu1 %v1732_v47 }
 0x129   :  { %v1576_v54 = vpop.f32.mrb[2].mxu0  ;;  %1735 = vmatpush3.bf16.msra.mxu1 %v1732_v47 }
 0x12a   :  { %v337_v55 = vadd.f32 %v1576_v54, %v264_v52  ;;  %v331_v56 = vpop.f32.mrb[3].mxu0  ;;  %1737 = vmatprep.subr.bf16.mxu1 %v1736_v53 }
 0x12b   :  { %v332_v57 = vadd.f32 %v331_v56, %v264_v52 }
 0x12c   :  { %v341_v59 = vmax.f32 %v337_v55, 0.0 }
 0x12d   :  { %v340_v58 = vmax.f32 %v332_v57, 0.0  ;;  %1739 = vmatpush3.bf16.msra.mxu1 %v1736_v53 }
 0x12e   :  { %1745 = vmatprep.subr.msk.bf16.mxu1 %vm1935_vm2, %v1862_v2 }
 0x12f   :  { %1609 = vmatprep.mubr.f32.mxu1 %v340_v58 }
 0x130   :  { %1610 = vmatmul.mubr.f32.vlgmr.msra.gmra.mrb[2].mxu1 %v341_v59 }
 0x131   :  { %1747 = vmatpush1.bf16.msk.msra.mxu1 %vm1943_vm5, %v1862_v2  ;;  %625 = vmatprep.mubr.f32.mxu1 %v1863_v4 }
 0x132   :  { %1753 = vmatprep.subr.msk.bf16.mxu1 %vm1960_vm10, %v1862_v2 }
 0x1e3   :  { %v1974_v11 = vpop.f32.mrb[0].mxu1 }
 0x1e4   :  { %v1976_v12 = vpop.f32.mrb[1].mxu1 }
 0x203   :  { %v1611_v15 = vpop.f32.mrb[2].mxu1 }
 0x204   :  { %v412_v16 = vpop.f32.mrb[3].mxu1  ;;  %v1986_v18 = vadd.f32 %v1611_v15, %v345_v14 }
 0x205   :  { %v1980_v17 = vadd.f32 %v412_v16, %v345_v14 }
 0x207   :  { %638 = vrot.lane.b32.xlu1 %v1980_v17, %s1864_s30  ;;  %553 = vrot.lane.b32.xlu0 %v1980_v17, %s1865_s3 }
 0x208   :  { %1356 = vmatmul.mubr.msk.f32.vlgmr.msra.gmra.mrb[4].mxu0 %vm469_vm12, %v1980_v17 }
 0x209   :  { %546 = vmatprep.mubr.f32.mxu0 %v1863_v4  ;;  %1751 = vmatpush1.bf16.msk.msra.mxu0 %vm1967_vm11, %v1862_v2 }
 0x20a   :  { %1757 = vmatprep.subr.msk.bf16.mxu0 %vm1935_vm2, %v1862_v2 }
 0x20b   :  { %723 = vrot.lane.b32.xlu1 %v1980_v17, %s1866_s4  ;;  %555 = vrot.lane.b32.xlu0 %v1986_v18, %s1865_s3 }
 0x20c   :  { %1357 = vmatmul.mubr.msk.f32.gmra.mrb[6].mxu0 %vm469_vm12, %v1986_v18 }
 0x20d   :  { %710 = vmatprep.mubr.f32.mxu0 %v1863_v4 }
 0x20f   :  { %725 = vrot.lane.b32.xlu1 %v1986_v18, %s1866_s4  ;;  %640 = vrot.lane.b32.xlu0 %v1986_v18, %s1864_s30  ;;  %s1845_s30 = scalar_lea.hbm %s2112_s2, 16 }
 0x210   :  { %p1846_p8 = scmp.ne.s32.totalorder %s2112_s2, %s1845_s30  ;;  %p1849_p9 = scmp.lt.u32.totalorder %s1845_s30, %s2112_s2 }
 0x212   :  { %p1851_p10 = pnand %p1849_p9, %p1846_p8 }
 0x213   :  { %937 = vrot.lane.b32.xlu1 %v1980_v17, %s1867_s5  ;;  %852 = vrot.lane.b32.xlu0 %v1980_v17, %s1868_s6 }
 0x217   :  { %939 = vrot.lane.b32.xlu1 %v1986_v18, %s1867_s5  ;;  %854 = vrot.lane.b32.xlu0 %v1986_v18, %s1868_s6 }
 0x21b   :  { %1103 = vrot.lane.b32.xlu0 %v2009_v20, %s1865_s3  ;;  %1105 = vrot.lane.b32.xlu1 %v2014_v22, %s1865_s3 }
 0x279   :  { %v639_v23 = vpop.permute.xlu1 %638  ;;  %v554_v24 = vpop.permute.xlu0 %553 }
 0x27a   :  { %1362 = vmatmul.mubr.msk.f32.vlgmr.msra.gmra.mrb[4].mxu1 %vm469_vm12, %v554_v24  ;;  %1368 = vmatmul.mubr.msk.f32.vlgmr.msra.gmra.mrb[8].mxu0 %vm469_vm12, %v639_v23 }
 0x27b   :  { %1755 = vmatpush1.bf16.msk.msra.mxu1 %vm1967_vm11, %v1862_v2  ;;  %631 = vmatprep.mubr.f32.mxu1 %v1863_v4 }
 0x27c   :  { %1761 = vmatprep.subr.msk.bf16.mxu1 %vm1935_vm2, %v1862_v2  ;;  %716 = vmatprep.mubr.f32.mxu0 %v1863_v4 }
 0x27d   :  { %v724_v25 = vpop.permute.xlu1 %723  ;;  %v556_v26 = vpop.permute.xlu0 %555  ;;  %1759 = vmatpush1.bf16.msk.msra.mxu0 %vm1943_vm5, %v1862_v2 }
 0x27e   :  { %1363 = vmatmul.mubr.msk.f32.gmra.mrb[6].mxu1 %vm469_vm12, %v556_v26  ;;  %1765 = vmatprep.subr.msk.bf16.mxu0 %vm1960_vm10, %v1862_v2 }
 0x27f   :  { %795 = vmatprep.mubr.f32.mxu1 %v1863_v4 }
 0x281   :  { %v726_v27 = vpop.permute.xlu1 %725  ;;  %v641_v28 = vpop.permute.xlu0 %640 }
 0x282   :  { %1369 = vmatmul.mubr.msk.f32.gmra.mrb[10].mxu0 %vm469_vm12, %v641_v28  ;;  %1374 = vmatmul.mubr.msk.f32.vlgmr.msra.gmra.mrb[8].mxu1 %vm469_vm12, %v724_v25 }
 0x283   :  { %1763 = vmatpush1.bf16.msk.msra.mxu1 %vm1943_vm5, %v1862_v2  ;;  %801 = vmatprep.mubr.f32.mxu1 %v1863_v4 }
 0x284   :  { %924 = vmatprep.mubr.f32.mxu0 %v1863_v4  ;;  %1769 = vmatprep.subr.msk.bf16.mxu1 %vm1960_vm10, %v1862_v2 }
 0x285   :  { %v853_v29 = vpop.permute.xlu0 %852  ;;  %v938_v30 = vpop.permute.xlu1 %937 }
 0x286   :  { %1375 = vmatmul.mubr.msk.f32.gmra.mrb[10].mxu1 %vm469_vm12, %v726_v27  ;;  %1380 = vmatmul.mubr.msk.f32.vlgmr.msra.gmra.mrb[12].mxu0 %vm469_vm12, %v853_v29 }
 0x287   :  { %1009 = vmatprep.mubr.f32.mxu1 %v1863_v4  ;;  %930 = vmatprep.mubr.f32.mxu0 %v1863_v4 }
 0x288   :  { %1767 = vmatpush1.bf16.msk.msra.mxu0 %vm1967_vm11, %v1862_v2 }
 0x289   :  { %v855_v31 = vpop.permute.xlu0 %854  ;;  %v940_v32 = vpop.permute.xlu1 %939 }
 0x28a   :  { %1381 = vmatmul.mubr.msk.f32.gmra.mrb[14].mxu0 %vm469_vm12, %v855_v31  ;;  %1386 = vmatmul.mubr.msk.f32.vlgmr.msra.gmra.mrb[12].mxu1 %vm469_vm12, %v938_v30 }
 0x28b   :  { %1771 = vmatpush1.bf16.msk.msra.mxu1 %vm1967_vm11, %v1862_v2  ;;  %1015 = vmatprep.mubr.f32.mxu1 %v1863_v4 }
 0x28c   :  { %1090 = vmatprep.mubr.f32.mxu0 %v1863_v4 }
 0x28d   :  { %v1104_v33 = vpop.permute.xlu0 %1103  ;;  %v1106_v34 = vpop.permute.xlu1 %1105 }
 0x28e   :  { %1387 = vmatmul.mubr.msk.f32.gmra.mrb[14].mxu1 %vm469_vm12, %v940_v32  ;;  %1392 = vmatmul.mubr.msk.f32.vlgmr.msra.gmra.mrb[16].mxu0 %vm469_vm12, %v2009_v20 }
 0x28f   :  { %1175 = vmatprep.mubr.f32.mxu1 %v1863_v4  ;;  %1096 = vmatprep.mubr.f32.mxu0 %v1863_v4 }
 0x292   :  { %1393 = vmatmul.mubr.msk.f32.gmra.mrb[18].mxu0 %vm469_vm12, %v2014_v22  ;;  %1398 = vmatmul.mubr.msk.f32.vlgmr.msra.gmra.mrb[16].mxu1 %vm469_vm12, %v1104_v33 }
 0x293   :  { %1181 = vmatprep.mubr.f32.mxu1 %v1863_v4 }
 0x296   :  { %1399 = vmatmul.mubr.msk.f32.gmra.mrb[18].mxu1 %vm469_vm12, %v1106_v34 }
 0x2db   :  { %v542_v35 = vpop.f32.mrb[4].mxu0 }
 0x2dc   :  { %v544_v36 = vpop.f32.mrb[5].mxu0 }
 0x2df   :  { %v548_v37 = vpop.f32.mrb[6].mxu0 }
 0x2e0   :  { %v550_v38 = vpop.f32.mrb[7].mxu0 }
 0x34d   :  { %v627_v40 = vpop.f32.mrb[4].mxu1  ;;  %v712_v41 = vpop.f32.mrb[8].mxu0 }
 0x34e   :  { %v808_v42 = vsub.f32 %v542_v35, %v712_v41  ;;  %v629_v43 = vpop.f32.mrb[5].mxu1  ;;  %v714_v44 = vpop.f32.mrb[9].mxu0 }
 0x34f   :  { %v809_v46 = vsub.f32 %v544_v36, %v714_v44 }
 0x350   :  { %v816_v58 = vmul.f32 %v808_v42, %v808_v42 }
 0x351   :  { %v633_v47 = vpop.f32.mrb[6].mxu1  ;;  %v817_v60 = vmul.f32 %v809_v46, %v809_v46 }
 0x352   :  { %v635_v48 = vpop.f32.mrb[7].mxu1 }
 0x355   :  { %v718_v49 = vpop.f32.mrb[10].mxu0  ;;  %v797_v50 = vpop.f32.mrb[8].mxu1 }
 0x356   :  { %v810_v52 = vsub.f32 %v548_v37, %v718_v49  ;;  %v812_v53 = vsub.f32 %v627_v40, %v797_v50  ;;  %v720_v54 = vpop.f32.mrb[11].mxu0  ;;  %v799_v55 = vpop.f32.mrb[9].mxu1 }
 0x357   :  { %v811_v56 = vsub.f32 %v550_v38, %v720_v54  ;;  %v813_v57 = vsub.f32 %v629_v43, %v799_v55 }
 0x358   :  { %v820_v59 = vmul.f32 %v812_v53, %v812_v53  ;;  %v818_v6 = vmul.f32 %v810_v52, %v810_v52 }
 0x359   :  { %v821_v61 = vmul.f32 %v813_v57, %v813_v57  ;;  %v803_v62 = vpop.f32.mrb[10].mxu1  ;;  %v926_v63 = vpop.f32.mrb[12].mxu0  ;;  %v819_v8 = vmul.f32 %v811_v56, %v811_v56 }
 0x35a   :  { %v824_v0 = vadd.f32 %v820_v59, %v816_v58  ;;  %v814_v1 = vsub.f32 %v633_v47, %v803_v62  ;;  %v805_v2 = vpop.f32.mrb[11].mxu1  ;;  %v928_v3 = vpop.f32.mrb[13].mxu0 }
 0x35b   :  { %v825_v4 = vadd.f32 %v821_v61, %v817_v60  ;;  %v815_v5 = vsub.f32 %v635_v48, %v805_v2 }
 0x35c   :  { %v822_v7 = vmul.f32 %v814_v1, %v814_v1 }
 0x35d   :  { %v823_v13 = vmul.f32 %v815_v5, %v815_v5  ;;  %v932_v14 = vpop.f32.mrb[14].mxu0  ;;  %v1011_v15 = vpop.f32.mrb[12].mxu1  ;;  %v828_v16 = vmin.f32 %v824_v0, %v825_v4 }
 0x35e   :  { %v826_v23 = vadd.f32 %v822_v7, %v818_v6  ;;  %v934_v24 = vpop.f32.mrb[15].mxu0  ;;  %v1013_v25 = vpop.f32.mrb[13].mxu1 }
 0x35f   :  { %v827_v26 = vadd.f32 %v823_v13, %v819_v8 }
 0x361   :  { %v1017_v27 = vpop.f32.mrb[14].mxu1  ;;  %v1092_v28 = vpop.f32.mrb[16].mxu0  ;;  %v831_v29 = vmin.f32 %v826_v23, %v827_v26 }
 0x362   :  { %v1188_v30 = vsub.f32 %v926_v63, %v1092_v28  ;;  %v1019_v31 = vpop.f32.mrb[15].mxu1  ;;  %v1094_v32 = vpop.f32.mrb[17].mxu0 }
 0x363   :  { %v1189_v33 = vsub.f32 %v928_v3, %v1094_v32  ;;  %v180_v32 = vsub.s32 1, %v1925_v19 }
 0x364   :  { %v1196_v42 = vmul.f32 %v1188_v30, %v1188_v30 }
 0x365   :  { %v1098_v34 = vpop.f32.mrb[18].mxu0  ;;  %v1177_v35 = vpop.f32.mrb[16].mxu1  ;;  %v1197_v44 = vmul.f32 %v1189_v33, %v1189_v33 }
 0x366   :  { %v1190_v36 = vsub.f32 %v932_v14, %v1098_v34  ;;  %v1192_v37 = vsub.f32 %v1011_v15, %v1177_v35  ;;  %v1100_v38 = vpop.f32.mrb[19].mxu0  ;;  %v1179_v39 = vpop.f32.mrb[17].mxu1 }
 0x367   :  { %v1191_v40 = vsub.f32 %v934_v24, %v1100_v38  ;;  %v1193_v41 = vsub.f32 %v1013_v25, %v1179_v39 }
 0x368   :  { %v1200_v43 = vmul.f32 %v1192_v37, %v1192_v37  ;;  %v1198_v54 = vmul.f32 %v1190_v36, %v1190_v36  ;;  %v181_v36 = vrot.slane %v1928_v21, %v180_v32 }
 0x369   :  { %v1201_v46 = vmul.f32 %v1193_v41, %v1193_v41  ;;  %v1183_v47 = vpop.f32.mrb[18].mxu1  ;;  %v1199_v56 = vmul.f32 %v1191_v40, %v1191_v40 }
 0x36a   :  { %v1204_v48 = vadd.f32 %v1200_v43, %v1196_v42  ;;  %v1194_v49 = vsub.f32 %v1017_v27, %v1183_v47  ;;  %v1185_v50 = vpop.f32.mrb[19].mxu1  ;;  %v254_v39 = vadd.f32 %v1974_v11, %v181_v36  ;;  %v249_v42 = vadd.f32 %v1976_v12, %v181_v36 }
 0x36b   :  { %v1205_v52 = vadd.f32 %v1201_v46, %v1197_v44  ;;  %v1195_v53 = vsub.f32 %v1019_v31, %v1185_v50  ;;  %v438_v50 = vsub.f32 %v1986_v18, %v1915_v51 }
 0x36c   :  { %v1202_v55 = vmul.f32 %v1194_v49, %v1194_v49 }
 0x36d   :  { %v1203_v57 = vmul.f32 %v1195_v53, %v1195_v53  ;;  %v1208_v58 = vmin.f32 %v1204_v48, %v1205_v52  ;;  %v437_v48 = vsub.f32 %v1980_v17, %v1904_v9 }
 0x36e   :  { %v1206_v59 = vadd.f32 %v1202_v55, %v1198_v54 }
 0x36f   :  { %v1207_v60 = vadd.f32 %v1203_v57, %v1199_v56  ;;  %1209 = vmin.xlane.f32.xlu0 %v1208_v58  ;;  %v439_v54 = vmul.f32 %v437_v48, %v437_v48  ;;  %v440_v56 = vmul.f32 %v438_v50, %v438_v50 }
 0x371   :  { %v1211_v61 = vmin.f32 %v1206_v59, %v1207_v60 }
 0x373   :  { %829 = vmin.xlane.f32.xlu0 %v828_v16  ;;  %1212 = vmin.xlane.f32.xlu1 %v1211_v61 }
 0x377   :  { %832 = vmin.xlane.f32.xlu0 %v831_v29 }
 0x384   :  { %1240 = vrot.lane.b32.xlu1 %v2009_v20, %s1870_s0 }
 0x38d   :  { %1242 = vrot.lane.b32.xlu0 %v2014_v22, %s1870_s0 }
 0x391   :  { %427 = vperm.xlu0 %1803, %v2009_v20  }
 0x395   :  { %1310 = vrot.lane.b32.xlu0 %v2009_v20, %s1871_s11 }
 0x3fc   :  { %v1210_v62 = vpop.xlane.xlu0 %1209 }
 0x3fd   :  { %1805 = vrsqrt.f32 %v1210_v62  ;;  %vm1216_vm13 = vcmp.eq.f32.partialorder %v1210_v62, inf  ;;  %v1219_v2 = vand.u32 2147483648, %v1210_v62  ;;  %vm1218_vm14 = vcmp.eq.f32.partialorder %v1210_v62, 0.0 }
 0x400   :  { %v1213_v63 = vpop.xlane.xlu1 %1212  ;;  %v830_v16 = vpop.xlane.xlu0 %829 }
 0x401   :  { %1807 = vrsqrt.f32 %v1213_v63  ;;  %vm1223_vm15 = vcmp.eq.f32.partialorder %v1213_v63, inf  ;;  %v1226_v8 = vand.u32 2147483648, %v1213_v63  ;;  %vm1225_vm0 = vcmp.eq.f32.partialorder %v1213_v63, 0.0 }
 0x402   :  { %1809 = vrsqrt.f32 %v830_v16  ;;  %vm836_vm2 = vcmp.eq.f32.partialorder %v830_v16, inf  ;;  %v839_v34 = vand.u32 2147483648, %v830_v16  ;;  %vm838_vm3 = vcmp.eq.f32.partialorder %v830_v16, 0.0 }
 0x404   :  { %v833_v23 = vpop.xlane.xlu0 %832  ;;  %v1241_v24 = vpop.permute.xlu1 %1240 }
 0x405   :  { %v1247_v27 = vsel %vm1246_vm1, %v1241_v24, 0.0  ;;  %1811 = vrsqrt.f32 %v833_v23  ;;  %vm843_vm4 = vcmp.eq.f32.partialorder %v833_v23, inf  ;;  %v846_v41 = vand.u32 2147483648, %v833_v23 }
 0x406   :  { %vm845_vm5 = vcmp.eq.f32.partialorder %v833_v23, 0.0  ;;  %1813 = vtanh.f32 %v254_v39 }
 0x407   :  { %v1806_v0 = vpop.eup %1805  ;;  %1815 = vtanh.f32 %v249_v42 }
 0x408   :  { %v1215_v1 = vmul.f32 %v1806_v0, %v1210_v62  ;;  %v1243_v25 = vpop.permute.xlu0 %1242 }
 0x409   :  { %v1248_v26 = vsel %vm1246_vm1, %v1243_v25, 0.0 }
 0x40a   :  { %v1217_v3 = vsel %vm1216_vm13, %v1210_v62, %v1215_v1  ;;  %v1249_v28 = vadd.f32 %v1248_v26, %v1247_v27 }
 0x40b   :  { %v1220_v4 = vsel %vm1218_vm14, %v1219_v2, %v1217_v3  ;;  %v1808_v5 = vpop.eup %1807 }
 0x40c   :  { %v1228_v6 = vmul.f32 %v1220_v4, %v2009_v20  ;;  %v1222_v7 = vmul.f32 %v1808_v5, %v1213_v63  ;;  %v1810_v29 = vpop.eup %1809 }
 0x40d   :  { %v835_v30 = vmul.f32 %v1810_v29, %v830_v16 }
 0x40e   :  { %1232 = vrot.lane.b32.xlu1 %v1228_v6, %s1872_s12  ;;  %v1224_v13 = vsel %vm1223_vm15, %v1213_v63, %v1222_v7 }
 0x40f   :  { %v1227_v14 = vsel %vm1225_vm0, %v1226_v8, %v1224_v13  ;;  %v1812_v31 = vpop.eup %1811  ;;  %v837_v33 = vsel %vm836_vm2, %v830_v16, %v835_v30 }
 0x410   :  { %v1229_v15 = vmul.f32 %v1227_v14, %v2014_v22  ;;  %v842_v35 = vmul.f32 %v1812_v31, %v833_v23  ;;  %v840_v37 = vsel %vm838_vm3, %v839_v34, %v837_v33  ;;  %v1814_v11 = vpop.eup %1813  ;;  %v428_v52 = vpop.permute.xlu0 %427 }
 0x411   :  { %v848_v40 = vmul.f32 %v840_v37, %v2009_v20  ;;  %v1816_v20 = vpop.eup %1815  ;;  %v422_v49 = vsub.f32 %v1922_v10, %v1814_v11 }
 0x412   :  { %1234 = vrot.lane.b32.xlu1 %v1229_v15, %s1872_s12  ;;  %v844_v38 = vsel %vm843_vm4, %v833_v23, %v842_v35  ;;  %v421_v12 = vsub.f32 %v1910_v45, %v1816_v20 }
 0x413   :  { %v847_v44 = vsel %vm845_vm5, %v846_v41, %v844_v38  ;;  %v424_v55 = vmul.f32 %v422_v49, %v422_v49 }
 0x414   :  { %v849_v21 = vmul.f32 %v847_v44, %v2014_v22  ;;  %v423_v53 = vmul.f32 %v421_v12, %v421_v12  ;;  %v1311_v0 = vpop.permute.xlu0 %1310 }
 0x415   :  { %v1317_v7 = vsel %vm1316_vm6, %v1311_v0, 0.0 }
 0x416   :  { %432 = vperm.xlu1 %1804, %v2014_v22   ;;  %v435_v58 = vmul.f32 %v428_v52, %v423_v53 }
 0x43a   :  { %1250 = vadd.xlane.f32.xlu1 %v1249_v28 }
 0x480   :  { %v1233_v43 = vpop.permute.xlu1 %1232 }
 0x481   :  { %v1238_v19 = vadd.f32 %v1233_v43, %v848_v40 }
 0x483   :  { %1292 = vrot.lane.b32.xlu0 %v1238_v19, %s1871_s11 }
 0x484   :  { %v1235_v46 = vpop.permute.xlu1 %1234 }
 0x485   :  { %v1239_v47 = vadd.f32 %v1235_v46, %v849_v21 }
 0x487   :  { %1294 = vrot.lane.b32.xlu0 %v1239_v47, %s1871_s11 }
 0x48b   :  { %1312 = vrot.lane.b32.xlu0 %v2014_v22, %s1871_s11  ;;  %v441_v22 = vmul.f32 %v439_v54, %v428_v52 }
 0x495   :  { %v433_v57 = vpop.permute.xlu1 %432 }
 0x496   :  { %v436_v59 = vmul.f32 %v433_v57, %v424_v55  ;;  %v442_v60 = vmul.f32 %v440_v56, %v433_v57 }
 0x498   :  { %v1274_v61 = vadd.f32 %v442_v60, %v441_v22  ;;  %v1259_v45 = vadd.f32 %v436_v59, %v435_v58 }
 0x49a   :  { %1275 = vadd.xlane.f32.xlu1 %v1274_v61 }
 0x4aa   :  { %1260 = vadd.xlane.f32.xlu0 %v1259_v45 }
 0x4c7   :  { %v1251_v9 = vpop.xlane.xlu1 %1250 }
 0x4c8   :  { %v1252_v17 = vrot.slane %v1251_v9, 4 }
 0x4ca   :  { %v1253_v10 = vadd.f32 %v1252_v17, %v1251_v9 }
 0x4cc   :  { %v1254_v62 = vrot.slane %v1253_v10, 2 }
 0x4ce   :  { %v1255_v63 = vadd.f32 %v1254_v62, %v1253_v10 }
 0x4d0   :  { %v1256_v51 = vrot.slane %v1255_v63, 1 }
 0x4d2   :  { %v1257_v18 = vadd.f32 %v1256_v51, %v1255_v63 }
 0x4d4   :  { %1772 = vpush %v1257_v18 }
 0x4f5   :  { %v1293_v1 = vpop.permute.xlu0 %1292 }
 0x4f6   :  { %v1298_v3 = vsel %vm1246_vm1, %v1293_v1, 0.0 }
 0x4f9   :  { %v1295_v2 = vpop.permute.xlu0 %1294 }
 0x4fa   :  { %v1299_v4 = vsel %vm1246_vm1, %v1295_v2, 0.0 }
 0x4fb   :  { %v1300_v5 = vadd.f32 %v1299_v4, %v1298_v3 }
 0x4fd   :  { %v1313_v6 = vpop.permute.xlu0 %1312  ;;  %1301 = vadd.xlane.f32.xlu1 %v1300_v5 }
 0x4fe   :  { %v1318_v8 = vsel %vm1316_vm6, %v1313_v6, 0.0 }
 0x4ff   :  { %v1319_v13 = vadd.f32 %v1318_v8, %v1317_v7 }
 0x501   :  { %1320 = vadd.xlane.f32.xlu1 %v1319_v13 }
 0x505   :  { %s1773_s13 = spop %1772 }
 0x506   :  { %s1284_s14 = smul.f32 4.0, %s1773_s13 }
 0x507   :  { %s1269_s15 = smul.f32 8.0, %s1773_s13 }
 0x508   :  { %s1285_s16 = smul.f32 32.0, %s1284_s14 }
 0x509   :  { %v1270_v23 = vstv %s1269_s15 }
 0x50a   :  { %v1286_v24 = vstv %s1285_s16  ;;  %1817 = vrcp.f32 %v1270_v23 }
 0x50b   :  { %1819 = vrcp.f32 %v1286_v24 }
 0x514   :  { %v1818_v34 = vpop.eup %1817 }
 0x515   :  { %v1820_v36 = vpop.eup %1819 }
 0x527   :  { %v1276_v14 = vpop.xlane.xlu1 %1275 }
 0x528   :  { %v1277_v15 = vrot.slane %v1276_v14, 4 }
 0x52a   :  { %v1278_v16 = vadd.f32 %v1277_v15, %v1276_v14 }
 0x52c   :  { %v1279_v26 = vrot.slane %v1278_v16, 2 }
 0x52e   :  { %v1280_v30 = vadd.f32 %v1279_v26, %v1278_v16 }
 0x530   :  { %v1281_v33 = vrot.slane %v1280_v30, 1 }
 0x532   :  { %v1282_v37 = vadd.f32 %v1281_v33, %v1280_v30 }
 0x537   :  { %v1261_v25 = vpop.xlane.xlu0 %1260 }
 0x538   :  { %v1262_v27 = vrot.slane %v1261_v25, 4 }
 0x53a   :  { %v1263_v28 = vadd.f32 %v1262_v27, %v1261_v25 }
 0x53c   :  { %v1264_v29 = vrot.slane %v1263_v28, 2 }
 0x53e   :  { %v1265_v31 = vadd.f32 %v1264_v29, %v1263_v28 }
 0x540   :  { %v1266_v32 = vrot.slane %v1265_v31, 1 }
 0x542   :  { %v1267_v35 = vadd.f32 %v1266_v32, %v1265_v31 }
 0x544   :  { %1774 = vpush %v1267_v35 }
 0x545   :  { %1776 = vpush %v1818_v34 }
 0x546   :  { %1778 = vpush %v1282_v37 }
 0x547   :  { %1780 = vpush %v1820_v36 }
 0x575   :  { %s1775_s17 = spop %1774 }
 0x576   :  { %s1777_s18 = spop %1776 }
 0x577   :  { %s1779_s19 = spop %1778  ;;  %s1273_s23 = smul.f32 %s1777_s18, %s1775_s17 }
 0x578   :  { %s1781_s20 = spop %1780 }
 0x579   :  { %s1289_s24 = smul.f32 %s1781_s20, %s1779_s19 }
 0x57b   :  { %s1333_s25 = sadd.f32 %s1289_s24, %s1273_s23 }
 0x58a   :  { %v1302_v38 = vpop.xlane.xlu1 %1301 }
 0x58b   :  { %v1303_v39 = vrot.slane %v1302_v38, 4 }
 0x58d   :  { %v1304_v40 = vadd.f32 %v1303_v39, %v1302_v38 }
 0x58e   :  { %v1321_v41 = vpop.xlane.xlu1 %1320 }
 0x58f   :  { %v1305_v42 = vrot.slane %v1304_v40, 2  ;;  %v1322_v43 = vrot.slane %v1321_v41, 4 }
 0x591   :  { %v1323_v19 = vadd.f32 %v1322_v43, %v1321_v41  ;;  %v1306_v44 = vadd.f32 %v1305_v42, %v1304_v40 }
 0x593   :  { %v1324_v21 = vrot.slane %v1323_v19, 2  ;;  %v1307_v46 = vrot.slane %v1306_v44, 1 }
 0x595   :  { %v1325_v47 = vadd.f32 %v1324_v21, %v1323_v19  ;;  %v1308_v11 = vadd.f32 %v1307_v46, %v1306_v44 }
 0x597   :  { %1782 = vpush %v1308_v11  ;;  %v1326_v20 = vrot.slane %v1325_v47, 1 }
 0x599   :  { %v1327_v12 = vadd.f32 %v1326_v20, %v1325_v47 }
 0x59b   :  { %1784 = vpush %v1327_v12 }
 0x5c8   :  { %s1783_s21 = spop %1782 }
 0x5cc   :  { %s1785_s22 = spop %1784 }
 0x5cd   :  { %v1329_v48 = vstv %s1785_s22 }
 0x5ce   :  { %1821 = vrcp.f32 %v1329_v48 }
 0x5d8   :  { %v1822_v49 = vpop.eup %1821 }
 0x5d9   :  { %1786 = vpush %v1822_v49 }
 0x60a   :  { %s1787_s1 = spop %1786 }
 0x60b   :  { %s1332_s26 = smul.f32 %s1787_s1, %s1783_s21 }
 0x60d   :  { %s1334_s27 = sadd.f32 %s1333_s25, %s1332_s26 }
 0x60f   :  { %1337 = sst [smem:[#allocation5]] %s1334_s27 }
 0x610   :  { %1854 = shalt.err (!%p1851_p10)
}
 0x611   :  { %s1873_s7 = smov [#allocation5]  }
 0x612   :  { %1345 = dma.smem_to_hbm %s1873_s7, 16, %s2112_s2, [#allocation4]  }
 0x613   :  { %1857 = dma.done.wait [#allocation4], 16  }
 0x614   :  { %1858 = vsyncadd [#allocation4], 4294967280 }
 0x615   :  { %1349 = sfence }
 0x616   :  { %1350 = vsyncpa [#allocation3], 1 }
 0x617   :  { %1351 = vsyncpa [#allocation4], 1 }

</bundles_post_ra>
